<compile_context>
chip_gen: v5e
topology: v5e:2x2
jax: 0.10.0
libtpu: 0.0.40
codegen_flags: <defaults>
</compile_context>

<pallas_src>
import functools

import jax
import jax.numpy as jnp
import numpy as np
from jax import lax
from jax.experimental import pallas as pl
from jax.experimental.pallas import tpu as pltpu


def _cdiv(a, b):
    return -(-a // b)


# bytes-per-element -> minimum legal sublane (row) multiple for a tiled block
_MIN_SUBLANES = {1: 32, 2: 16, 4: 8, 8: 8}


def _nss_kernel(x_ref, t_ref, o_ref, sx_ref, sxx_ref, sxt_ref, st_ref,
                *, n_lanes, lane_tile):
    """One (TR, TL) tile: accumulate single-pass row moments; finalize on the last lane step."""
    j = pl.program_id(1)
    nj = pl.num_programs(1)

    @pl.when(j == 0)
    def _init():
        sx_ref[...] = jnp.zeros_like(sx_ref)
        sxx_ref[...] = jnp.zeros_like(sxx_ref)
        sxt_ref[...] = jnp.zeros_like(sxt_ref)
        st_ref[...] = jnp.zeros_like(st_ref)

    x = x_ref[...].astype(jnp.float32)
    m = (t_ref[...] != 0).astype(jnp.float32)        # target_logic

    def accum(xv, mv):
        # jnp.sum lowers to VALU vreg adds + one cross-lane reduce per tile
        # (amortized over the whole lane tile), so this stays HBM-bound.
        sx_ref[...] += jnp.sum(xv, axis=1, keepdims=True)
        sxx_ref[...] += jnp.sum(xv * xv, axis=1, keepdims=True)
        sxt_ref[...] += jnp.sum(xv * mv, axis=1, keepdims=True)
        st_ref[...] += jnp.sum(mv, axis=1, keepdims=True)

    if n_lanes % lane_tile != 0:
        # Ragged lane tail exists (statically known): mask garbage lanes, but
        # only pay for the mask on the last lane step.
        @pl.when(j < nj - 1)
        def _body():
            accum(x, m)

        @pl.when(j == nj - 1)
        def _tail():
            lane = lax.broadcasted_iota(jnp.int32, x.shape, dimension=1)
            valid = (lane + j * lane_tile) < n_lanes
            # jnp.where (not multiply) so NaN/Inf garbage in the OOB region is exact-zeroed.
            accum(jnp.where(valid, x, 0.0), jnp.where(valid, m, 0.0))
    else:
        accum(x, m)

    @pl.when(j == nj - 1)
    def _finalize():
        L = jnp.float32(n_lanes)
        sx = sx_ref[...]
        mu = sx / L
        # unbiased (L-1) variance, matching torch.std default.
        # NOTE: L == 1 or a constant row gives inf/NaN, matching torch behavior.
        var = (sxx_ref[...] - sx * mu) / jnp.float32(n_lanes - 1)
        var = jnp.maximum(var, 0.0)                  # guard one-pass cancellation
        inv_std = lax.rsqrt(var)                     # EUP rsqrt, epilogue only
        o_ref[...] = -(sxt_ref[...] - mu * st_ref[...]) * inv_std / L


def _choose_tiles(n_rows, n_lanes, itemsize_x, itemsize_t):
    """~4 MiB per input per pipeline buffer, dtype-aware row/lane multiples."""
    per_input_budget = 4 * 1024 * 1024
    bpe = max(itemsize_x, itemsize_t)
    row_mult = max(_MIN_SUBLANES.get(itemsize_x, 8), _MIN_SUBLANES.get(itemsize_t, 8))

    tr0 = n_rows if n_rows <= row_mult else row_mult
    max_tl = max((per_input_budget // (tr0 * bpe)) // 128 * 128, 128)
    if n_lanes <= max_tl:
        tl = n_lanes                              # full-extent lane block (no 128 constraint)
    else:
        n_chunks = _cdiv(n_lanes, max_tl)
        tl = _cdiv(_cdiv(n_lanes, n_chunks), 128) * 128

    if n_rows <= row_mult:
        tr = n_rows                               # full-extent row block (no sublane constraint)
    else:
        # grow row tile (multiples of row_mult, never past n_rows) to fill the budget
        tr_cap = max(per_input_budget // (tl * bpe), row_mult)
        tr = min(tr_cap // row_mult * row_mult, (n_rows // row_mult) * row_mult)
        tr = max(tr, row_mult)
    return tr, tl


def norm_scan_sali_loss(inp, tgt, *, lane_tile=None):
    """inp, tgt: (B, ...) arrays (any float/int dtype). Returns the scalar loss (f32)."""
    B = inp.shape[0]
    L = int(np.prod(inp.shape[1:]))
    x = inp.reshape(B, L)            # no dtype upcast: kernel casts per tile
    t = tgt.reshape(B, L)

    TR, TL = _choose_tiles(B, L, x.dtype.itemsize, t.dtype.itemsize)
    if lane_tile is not None:        # debug/tuning override (multiple of 128, or >= L)
        TL = min(lane_tile, L)

    grid = (_cdiv(B, TR), _cdiv(L, TL))

    bytes_accessed = x.size * x.dtype.itemsize + t.size * t.dtype.itemsize + 4 * B

    per_row = pl.pallas_call(
        functools.partial(_nss_kernel, n_lanes=L, lane_tile=TL),
        out_shape=jax.ShapeDtypeStruct((B, 1), jnp.float32),
        grid_spec=pltpu.PrefetchScalarGridSpec(
            num_scalar_prefetch=0,
            grid=grid,
            in_specs=[
                pl.BlockSpec((TR, TL), lambda i, j: (i, j)),
                pl.BlockSpec((TR, TL), lambda i, j: (i, j)),
            ],
            out_specs=pl.BlockSpec((TR, 1), lambda i, j: (i, 0)),
            scratch_shapes=[pltpu.VMEM((TR, 1), jnp.float32)] * 4,
        ),
        compiler_params=pltpu.CompilerParams(
            dimension_semantics=("parallel", "arbitrary"),
            vmem_limit_bytes=48 * 1024 * 1024,
        ),
        cost_estimate=pl.CostEstimate(
            flops=8 * B * L,
            transcendentals=B,
            bytes_accessed=bytes_accessed,
        ),
    )(x, t)

    # tiny final reduction over the batch
    return jnp.mean(per_row[:, 0])


def _reference(inp, tgt):
    """Pure-JAX reference matching the PyTorch MyNormScanSali semantics."""
    B = inp.shape[0]
    x = inp.reshape(B, -1).astype(jnp.float32)
    t = tgt.reshape(B, -1).astype(jnp.float32)
    mu = jnp.mean(x, axis=1, keepdims=True)
    std = jnp.std(x, axis=1, ddof=1, keepdims=True)   # torch.std default: unbiased
    x_norm = (x - mu) / std
    t_logic = (t != 0).astype(jnp.float32)
    nss = jnp.mean(-1.0 * x_norm * t_logic, axis=1)
    return jnp.mean(nss)


if __name__ == "__main__":
    key = jax.random.PRNGKey(0)
    k1, k2, k3, k4 = jax.random.split(key, 4)

    # Case 1: native f32 input / f32 fixation map (the module's usual dtypes).
    B, C, H, W = 2, 4, 16, 16
    inp = jax.random.normal(k1, (B, C, H, W), dtype=jnp.float32)
    tgt = (jax.random.uniform(k2, (B, C, H, W)) > 0.9).astype(jnp.float32)
    loss = jax.block_until_ready(norm_scan_sali_loss(inp, tgt))
    ref = jax.block_until_ready(_reference(inp, tgt))
    np.testing.assert_allclose(np.asarray(loss), np.asarray(ref), rtol=1e-4, atol=1e-5)

    # Case 2: bf16 input + int8 fixation map (narrow-dtype path, no wrapper upcast).
    loss2 = jax.block_until_ready(
        norm_scan_sali_loss(inp.astype(jnp.bfloat16), (tgt != 0).astype(jnp.int8)))
    ref2 = jax.block_until_ready(
        _reference(inp.astype(jnp.bfloat16), (tgt != 0).astype(jnp.int8)))
    np.testing.assert_allclose(np.asarray(loss2), np.asarray(ref2), rtol=1e-3, atol=1e-4)

    # Case 3: ragged lane tail (L = 1020, lane tile 256) exercises the in-kernel mask
    # that replaced the old jnp.pad round trip.
    inp3 = jax.random.normal(k3, (2, 3, 17, 20), dtype=jnp.float32)
    tgt3 = (jax.random.uniform(k4, (2, 3, 17, 20)) > 0.9).astype(jnp.float32)
    loss3 = jax.block_until_ready(norm_scan_sali_loss(inp3, tgt3, lane_tile=256))
    ref3 = jax.block_until_ready(_reference(inp3, tgt3))
    np.testing.assert_allclose(np.asarray(loss3), np.asarray(ref3), rtol=1e-4, atol=1e-5)

    print("KERNEL_OK")
</pallas_src>

<mosaic_0001>
module attributes {stable_mosaic.version = 11 : i64} {
  func.func @_nss_kernel(%arg0: i32, %arg1: i32, %arg2: memref<2x1024xf32, #tpu.memory_space<vmem>>, %arg3: memref<2x1024xf32, #tpu.memory_space<vmem>>, %arg4: memref<2x1xf32, #tpu.memory_space<vmem>>, %arg5: memref<2x1xf32, #tpu.memory_space<vmem>>, %arg6: memref<2x1xf32, #tpu.memory_space<vmem>>, %arg7: memref<2x1xf32, #tpu.memory_space<vmem>>, %arg8: memref<2x1xf32, #tpu.memory_space<vmem>>) attributes {dimension_semantics = [#tpu.dimension_semantics<parallel>, #tpu.dimension_semantics<arbitrary>], iteration_bounds = array<i64: 1, 1>, scalar_prefetch = 0 : i64, scratch_operands = 4 : i64, tpu.core_type = #tpu.core_type<tc>, window_params = [{transform_indices = @transform_0, window_bounds = array<i64: 2, 1024>}, {transform_indices = @transform_1, window_bounds = array<i64: 2, 1024>}, {transform_indices = @transform_2, window_bounds = array<i64: 2, 1>}]} {
    %c0_i32 = arith.constant 0 : i32
    %0 = arith.cmpi eq, %arg1, %c0_i32 : i32
    %1 = arith.extui %0 : i1 to i32
    %c0_i32_0 = arith.constant 0 : i32
    %2 = arith.cmpi ne, %1, %c0_i32_0 : i32
    scf.if %2 {
      %cst_26 = arith.constant 0.000000e+00 : f32
      %34 = vector.broadcast %cst_26 : f32 to vector<2x1xf32>
      %c0_27 = arith.constant 0 : index
      %c0_28 = arith.constant 0 : index
      %35 = vector.load %arg5[%c0_27, %c0_28] : memref<2x1xf32, #tpu.memory_space<vmem>>, vector<2x1xf32>
      tpu.vector_store %arg5[%c0_27, %c0_28], %34 {strides = array<i32>} : memref<2x1xf32, #tpu.memory_space<vmem>>, vector<2x1xf32>,
      %cst_29 = arith.constant 0.000000e+00 : f32
      %36 = vector.broadcast %cst_29 : f32 to vector<2x1xf32>
      %c0_30 = arith.constant 0 : index
      %c0_31 = arith.constant 0 : index
      %37 = vector.load %arg6[%c0_30, %c0_31] : memref<2x1xf32, #tpu.memory_space<vmem>>, vector<2x1xf32>
      tpu.vector_store %arg6[%c0_30, %c0_31], %36 {strides = array<i32>} : memref<2x1xf32, #tpu.memory_space<vmem>>, vector<2x1xf32>,
      %cst_32 = arith.constant 0.000000e+00 : f32
      %38 = vector.broadcast %cst_32 : f32 to vector<2x1xf32>
      %c0_33 = arith.constant 0 : index
      %c0_34 = arith.constant 0 : index
      %39 = vector.load %arg7[%c0_33, %c0_34] : memref<2x1xf32, #tpu.memory_space<vmem>>, vector<2x1xf32>
      tpu.vector_store %arg7[%c0_33, %c0_34], %38 {strides = array<i32>} : memref<2x1xf32, #tpu.memory_space<vmem>>, vector<2x1xf32>,
      %cst_35 = arith.constant 0.000000e+00 : f32
      %40 = vector.broadcast %cst_35 : f32 to vector<2x1xf32>
      %c0_36 = arith.constant 0 : index
      %c0_37 = arith.constant 0 : index
      %41 = vector.load %arg8[%c0_36, %c0_37] : memref<2x1xf32, #tpu.memory_space<vmem>>, vector<2x1xf32>
      tpu.vector_store %arg8[%c0_36, %c0_37], %40 {strides = array<i32>} : memref<2x1xf32, #tpu.memory_space<vmem>>, vector<2x1xf32>,
    } else {
    }
    %c0 = arith.constant 0 : index
    %c0_1 = arith.constant 0 : index
    %3 = vector.load %arg2[%c0, %c0_1] : memref<2x1024xf32, #tpu.memory_space<vmem>>, vector<2x1024xf32>
    %c0_2 = arith.constant 0 : index
    %c0_3 = arith.constant 0 : index
    %4 = vector.load %arg3[%c0_2, %c0_3] : memref<2x1024xf32, #tpu.memory_space<vmem>>, vector<2x1024xf32>
    %cst = arith.constant 0.000000e+00 : f32
    %5 = vector.broadcast %cst : f32 to vector<2x1024xf32>
    %6 = arith.cmpf one, %4, %5 : vector<2x1024xf32>
    %7 = arith.extui %6 : vector<2x1024xi1> to vector<2x1024xi32>
    %8 = arith.sitofp %7 : vector<2x1024xi32> to vector<2x1024xf32>
    %c0_4 = arith.constant 0 : index
    %c0_5 = arith.constant 0 : index
    %9 = vector.load %arg5[%c0_4, %c0_5] : memref<2x1xf32, #tpu.memory_space<vmem>>, vector<2x1xf32>
    %cst_6 = arith.constant dense<0.000000e+00> : vector<2xf32>
    %10 = vector.multi_reduction <add>, %3, %cst_6 [1] : vector<2x1024xf32> to vector<2xf32>
    %11 = vector.shape_cast %10 : vector<2xf32> to vector<2x1xf32>
    %12 = arith.addf %9, %11 : vector<2x1xf32>
    %c0_7 = arith.constant 0 : index
    %c0_8 = arith.constant 0 : index
    %13 = vector.load %arg5[%c0_7, %c0_8] : memref<2x1xf32, #tpu.memory_space<vmem>>, vector<2x1xf32>
    tpu.vector_store %arg5[%c0_7, %c0_8], %12 {strides = array<i32>} : memref<2x1xf32, #tpu.memory_space<vmem>>, vector<2x1xf32>,
    %c0_9 = arith.constant 0 : index
    %c0_10 = arith.constant 0 : index
    %14 = vector.load %arg6[%c0_9, %c0_10] : memref<2x1xf32, #tpu.memory_space<vmem>>, vector<2x1xf32>
    %15 = arith.mulf %3, %3 : vector<2x1024xf32>
    %cst_11 = arith.constant dense<0.000000e+00> : vector<2xf32>
    %16 = vector.multi_reduction <add>, %15, %cst_11 [1] : vector<2x1024xf32> to vector<2xf32>
    %17 = vector.shape_cast %16 : vector<2xf32> to vector<2x1xf32>
    %18 = arith.addf %14, %17 : vector<2x1xf32>
    %c0_12 = arith.constant 0 : index
    %c0_13 = arith.constant 0 : index
    %19 = vector.load %arg6[%c0_12, %c0_13] : memref<2x1xf32, #tpu.memory_space<vmem>>, vector<2x1xf32>
    tpu.vector_store %arg6[%c0_12, %c0_13], %18 {strides = array<i32>} : memref<2x1xf32, #tpu.memory_space<vmem>>, vector<2x1xf32>,
    %c0_14 = arith.constant 0 : index
    %c0_15 = arith.constant 0 : index
    %20 = vector.load %arg7[%c0_14, %c0_15] : memref<2x1xf32, #tpu.memory_space<vmem>>, vector<2x1xf32>
    %21 = arith.mulf %3, %8 : vector<2x1024xf32>
    %cst_16 = arith.constant dense<0.000000e+00> : vector<2xf32>
    %22 = vector.multi_reduction <add>, %21, %cst_16 [1] : vector<2x1024xf32> to vector<2xf32>
    %23 = vector.shape_cast %22 : vector<2xf32> to vector<2x1xf32>
    %24 = arith.addf %20, %23 : vector<2x1xf32>
    %c0_17 = arith.constant 0 : index
    %c0_18 = arith.constant 0 : index
    %25 = vector.load %arg7[%c0_17, %c0_18] : memref<2x1xf32, #tpu.memory_space<vmem>>, vector<2x1xf32>
    tpu.vector_store %arg7[%c0_17, %c0_18], %24 {strides = array<i32>} : memref<2x1xf32, #tpu.memory_space<vmem>>, vector<2x1xf32>,
    %c0_19 = arith.constant 0 : index
    %c0_20 = arith.constant 0 : index
    %26 = vector.load %arg8[%c0_19, %c0_20] : memref<2x1xf32, #tpu.memory_space<vmem>>, vector<2x1xf32>
    %cst_21 = arith.constant dense<0.000000e+00> : vector<2xf32>
    %27 = vector.multi_reduction <add>, %8, %cst_21 [1] : vector<2x1024xf32> to vector<2xf32>
    %28 = vector.shape_cast %27 : vector<2xf32> to vector<2x1xf32>
    %29 = arith.addf %26, %28 : vector<2x1xf32>
    %c0_22 = arith.constant 0 : index
    %c0_23 = arith.constant 0 : index
    %30 = vector.load %arg8[%c0_22, %c0_23] : memref<2x1xf32, #tpu.memory_space<vmem>>, vector<2x1xf32>
    tpu.vector_store %arg8[%c0_22, %c0_23], %29 {strides = array<i32>} : memref<2x1xf32, #tpu.memory_space<vmem>>, vector<2x1xf32>,
    %c0_i32_24 = arith.constant 0 : i32
    %31 = arith.cmpi eq, %arg1, %c0_i32_24 : i32
    %32 = arith.extui %31 : i1 to i32
    %c0_i32_25 = arith.constant 0 : i32
    %33 = arith.cmpi ne, %32, %c0_i32_25 : i32
    scf.if %33 {
      %c0_26 = arith.constant 0 : index
      %c0_27 = arith.constant 0 : index
      %34 = vector.load %arg5[%c0_26, %c0_27] : memref<2x1xf32, #tpu.memory_space<vmem>>, vector<2x1xf32>
      %cst_28 = arith.constant 1.024000e+03 : f32
      %35 = vector.broadcast %cst_28 : f32 to vector<2x1xf32>
      %36 = arith.divf %34, %35 : vector<2x1xf32>
      %c0_29 = arith.constant 0 : index
      %c0_30 = arith.constant 0 : index
      %37 = vector.load %arg6[%c0_29, %c0_30] : memref<2x1xf32, #tpu.memory_space<vmem>>, vector<2x1xf32>
      %38 = arith.mulf %34, %36 : vector<2x1xf32>
      %39 = arith.subf %37, %38 : vector<2x1xf32>
      %cst_31 = arith.constant 1.023000e+03 : f32
      %40 = vector.broadcast %cst_31 : f32 to vector<2x1xf32>
      %41 = arith.divf %39, %40 : vector<2x1xf32>
      %cst_32 = arith.constant 0.000000e+00 : f32
      %42 = vector.broadcast %cst_32 : f32 to vector<2x1xf32>
      %43 = arith.maximumf %41, %42 : vector<2x1xf32>
      %44 = math.rsqrt %43 : vector<2x1xf32>
      %c0_33 = arith.constant 0 : index
      %c0_34 = arith.constant 0 : index
      %45 = vector.load %arg7[%c0_33, %c0_34] : memref<2x1xf32, #tpu.memory_space<vmem>>, vector<2x1xf32>
      %c0_35 = arith.constant 0 : index
      %c0_36 = arith.constant 0 : index
      %46 = vector.load %arg8[%c0_35, %c0_36] : memref<2x1xf32, #tpu.memory_space<vmem>>, vector<2x1xf32>
      %47 = arith.mulf %36, %46 : vector<2x1xf32>
      %48 = arith.subf %45, %47 : vector<2x1xf32>
      %cst_37 = arith.constant 0.000000e+00 : f32
      %49 = vector.broadcast %cst_37 : f32 to vector<2x1xf32>
      %50 = arith.subf %49, %48 : vector<2x1xf32>
      %51 = arith.mulf %50, %44 : vector<2x1xf32>
      %cst_38 = arith.constant 1.024000e+03 : f32
      %52 = vector.broadcast %cst_38 : f32 to vector<2x1xf32>
      %53 = arith.divf %51, %52 : vector<2x1xf32>
      %c0_39 = arith.constant 0 : index
      %c0_40 = arith.constant 0 : index
      %54 = vector.load %arg4[%c0_39, %c0_40] : memref<2x1xf32, #tpu.memory_space<vmem>>, vector<2x1xf32>
      tpu.vector_store %arg4[%c0_39, %c0_40], %53 {strides = array<i32>} : memref<2x1xf32, #tpu.memory_space<vmem>>, vector<2x1xf32>,
    } else {
    }
    return
  }
  func.func @transform_0(%arg0: i32, %arg1: i32) -> (i32, i32) {
    %c0_i32 = arith.constant 0 : i32
    return %arg0, %arg1 : i32, i32
  }
  func.func @transform_1(%arg0: i32, %arg1: i32) -> (i32, i32) {
    %c0_i32 = arith.constant 0 : i32
    return %arg0, %arg1 : i32, i32
  }
  func.func @transform_2(%arg0: i32, %arg1: i32) -> (i32, i32) {
    %c0_i32 = arith.constant 0 : i32
    %c0_i32_0 = arith.constant 0 : i32
    return %arg0, %c0_i32 : i32, i32
  }
}

</mosaic_0001>

<bundles_post_ra>
// kernel: tpu_custom_call.1
= control target key start
LH: loop header
LB: loop body
LE: loop exit
PB: predicated region body
PF: predicated region fallthrough
CT: control target
= control target key end

     0   :  { %7 = vsyncpa [#allocation7], 0  ;;  %s411_s0 = inlined_call_operand.hbm [shape: f32[2,1024], index: 0, kind: input, shape index: {}]   ;;  %s412_s1 = inlined_call_operand.hbm [shape: f32[2,1024], index: 1, kind: input, shape index: {}]   ;;  %s413_s2 = inlined_call_operand.vmem [shape: f32[2,1], index: 2, kind: output, shape index: {}]  }
   0x1   :  { %s14_s11 = sshll.u32 %s411_s0, 4  ;;  %s15_s11 = int_to_ptr.hbm [resolvable:$true] %s14_s11 }
   0x2   :  { %8 = vsyncpa [#allocation9], 0  ;;  %s341_s12 = smov [#allocation6]   ;;  %s25_s16 = sshll.u32 %s412_s1, 4  ;;  %s26_s16 = int_to_ptr.hbm [resolvable:$true] %s25_s16 }
   0x3   :  { %s16_s13 = sshll.u32 %s341_s12, 4  ;;  %s342_s17 = smov [#allocation8]   ;;  %s17_s13 = int_to_ptr.vmem [resolvable:$true] %s16_s13 }
   0x4   :  { %19 = dma.hbm_to_vmem [thread:$0]  %s15_s11, 256, %s17_s13, [#allocation7]  }
   0x5   :  { %s27_s18 = sshll.u32 %s342_s17, 4  ;;  %s28_s18 = int_to_ptr.vmem [resolvable:$true] %s27_s18 }
   0x6   :  { %30 = dma.hbm_to_vmem [thread:$0]  %s26_s16, 256, %s28_s18, [#allocation9]  }
   0x7   :  { %337 = dma.done.wait [#allocation7], 256  }
   0x8   :  { %338 = vsyncadd [#allocation7], 4294967040 }
   0x9   :  { %339 = dma.done.wait [#allocation9], 256  }
   0xa   :  { %340 = vsyncadd [#allocation9], 4294967040  ;;  %v48_v0 = vld [vmem:[#allocation6] sm:$0xff]  ;;  %v49_v1 = vld [vmem:[#allocation6 + $0x8] sm:$0xff]  ;;  %vm80_vm0 = vcmask 1041408   ;;  %v343_v20 = vmov 0.0  }
   0xb   :  { %61 = vst [vmem:[#allocation1] ss:$4 sm:$0xff] %v48_v0  ;;  %v50_v2 = vld [vmem:[#allocation8] sm:$0xff]  ;;  %v102_v5 = vmul.f32 %v48_v0, %v48_v0  ;;  %v51_v6 = vld [vmem:[#allocation8 + $0x8] sm:$0xff]  ;;  %v103_v9 = vmul.f32 %v49_v1, %v49_v1  ;;  %vm43_vm3 = vcmask 1024  }
   0xc   :  { %63 = vst [vmem:[#allocation1 + $0x20] ss:$4 sm:$0xff] %v49_v1  ;;  %vm52_vm1 = vcmp.ne.f32.partialorder %v50_v2, 0.0  ;;  %vm53_vm2 = vcmp.ne.f32.partialorder %v51_v6, 0.0 }
   0xd   :  { %v276_v21 = vsel %vm52_vm1, 1.0, %v343_v20  ;;  %v277_v23 = vsel %vm53_vm2, 1.0, %v343_v20  ;;  %44 = vst.msk [vmem:[#allocation2] sm:$0x3] %vm43_vm3, %v343_v20 }
   0xe   :  { %v145_v29 = vmul.f32 %v276_v21, %v48_v0  ;;  %v146_v32 = vmul.f32 %v277_v23, %v49_v1  ;;  %45 = vst.msk [vmem:[#allocation3] sm:$0x3] %vm43_vm3, %v343_v20 }
   0xf   :  { %46 = vst.msk [vmem:[#allocation4] sm:$0x3] %vm43_vm3, %v343_v20 }
  0x10   :  { %47 = vst.msk [vmem:[#allocation5] sm:$0x3] %vm43_vm3, %v343_v20 }
  0x12   :  { %v64_v3 = vld.sshfl [vmem:[#allocation1] sm:$0xff pattern:$0x73625140]  ;;  %v65_v4 = vld.sshfl [vmem:[#allocation1 + $0x8] sm:$0xff pattern:$0x73625140] }
  0x13   :  { %v66_v7 = vld.sshfl [vmem:[#allocation1 + $0x10] sm:$0xff pattern:$0x73625140]  ;;  %v67_v8 = vld.sshfl [vmem:[#allocation1 + $0x18] sm:$0xff pattern:$0x73625140] }
  0x14   :  { %v68_v10 = vld.sshfl [vmem:[#allocation1 + $0x20] sm:$0xff pattern:$0x73625140]  ;;  %v69_v11 = vld.sshfl [vmem:[#allocation1 + $0x28] sm:$0xff pattern:$0x73625140] }
  0x15   :  { %v70_v12 = vld.sshfl [vmem:[#allocation1 + $0x30] sm:$0xff pattern:$0x73625140]  ;;  %v71_v13 = vld.sshfl [vmem:[#allocation1 + $0x38] sm:$0xff pattern:$0x73625140] }
  0x16   :  { %v81_v14 = vsel %vm80_vm0, %v64_v3, 0.0  ;;  %v82_v15 = vsel %vm80_vm0, %v65_v4, 0.0  ;;  %v84_v16 = vsel %vm80_vm0, %v66_v7, 0.0  ;;  %106 = vst [vmem:[#allocation1] ss:$4 sm:$0xff] %v102_v5  ;;  %v86_v18 = vsel %vm80_vm0, %v67_v8, 0.0 }
  0x17   :  { %v83_v17 = vadd.f32 %v82_v15, %v81_v14  ;;  %108 = vst [vmem:[#allocation1 + $0x20] ss:$4 sm:$0xff] %v103_v9  ;;  %v88_v22 = vsel %vm80_vm0, %v68_v10, 0.0  ;;  %v90_v25 = vsel %vm80_vm0, %v69_v11, 0.0  ;;  %v92_v26 = vsel %vm80_vm0, %v70_v12, 0.0 }
  0x18   :  { %v94_v27 = vsel %vm80_vm0, %v71_v13, 0.0 }
  0x19   :  { %v85_v19 = vadd.f32 %v84_v16, %v83_v17 }
  0x1b   :  { %v87_v24 = vadd.f32 %v86_v18, %v85_v19 }
  0x1d   :  { %v89_v28 = vadd.f32 %v88_v22, %v87_v24  ;;  %v109_v30 = vld.sshfl [vmem:[#allocation1] sm:$0xff pattern:$0x73625140]  ;;  %v110_v31 = vld.sshfl [vmem:[#allocation1 + $0x8] sm:$0xff pattern:$0x73625140] }
  0x1e   :  { %v111_v33 = vld.sshfl [vmem:[#allocation1 + $0x10] sm:$0xff pattern:$0x73625140]  ;;  %v112_v34 = vld.sshfl [vmem:[#allocation1 + $0x18] sm:$0xff pattern:$0x73625140] }
  0x1f   :  { %v91_v35 = vadd.f32 %v90_v25, %v89_v28  ;;  %v113_v36 = vld.sshfl [vmem:[#allocation1 + $0x20] sm:$0xff pattern:$0x73625140]  ;;  %v114_v37 = vld.sshfl [vmem:[#allocation1 + $0x28] sm:$0xff pattern:$0x73625140] }
  0x20   :  { %v115_v38 = vld.sshfl [vmem:[#allocation1 + $0x30] sm:$0xff pattern:$0x73625140]  ;;  %v116_v39 = vld.sshfl [vmem:[#allocation1 + $0x38] sm:$0xff pattern:$0x73625140] }
  0x21   :  { %v93_v40 = vadd.f32 %v92_v26, %v91_v35  ;;  %v125_v41 = vsel %vm80_vm0, %v109_v30, 0.0  ;;  %v126_v42 = vsel %vm80_vm0, %v110_v31, 0.0  ;;  %v128_v43 = vsel %vm80_vm0, %v111_v33, 0.0  ;;  %149 = vst [vmem:[#allocation1] ss:$4 sm:$0xff] %v145_v29 }
  0x22   :  { %v127_v44 = vadd.f32 %v126_v42, %v125_v41  ;;  %151 = vst [vmem:[#allocation1 + $0x20] ss:$4 sm:$0xff] %v146_v32  ;;  %v130_v46 = vsel %vm80_vm0, %v112_v34, 0.0  ;;  %v132_v48 = vsel %vm80_vm0, %v113_v36, 0.0  ;;  %v134_v50 = vsel %vm80_vm0, %v114_v37, 0.0 }
  0x23   :  { %v95_v45 = vadd.f32 %v94_v27, %v93_v40  ;;  %v136_v51 = vsel %vm80_vm0, %v115_v38, 0.0  ;;  %v138_v52 = vsel %vm80_vm0, %v116_v39, 0.0  ;;  %v344_v39 = vmov 1024.0  }
  0x24   :  { %v129_v47 = vadd.f32 %v128_v43, %v127_v44  ;;  %283 = vrcp.f32 %v344_v39  ;;  %v345_v41 = vmov 1023.0   ;;  %v58_v43 = vld [vmem:[#allocation2] sm:$0x3] }
  0x25   :  { %96 = vadd.xlane.f32.xlu0 %v95_v45  ;;  %285 = vrcp.f32 %v345_v41 }
  0x26   :  { %v131_v49 = vadd.f32 %v130_v46, %v129_v47 }
  0x28   :  { %v133_v53 = vadd.f32 %v132_v48, %v131_v49  ;;  %v152_v54 = vld.sshfl [vmem:[#allocation1] sm:$0xff pattern:$0x73625140]  ;;  %v153_v55 = vld.sshfl [vmem:[#allocation1 + $0x8] sm:$0xff pattern:$0x73625140] }
  0x29   :  { %v154_v56 = vld.sshfl [vmem:[#allocation1 + $0x10] sm:$0xff pattern:$0x73625140]  ;;  %v155_v57 = vld.sshfl [vmem:[#allocation1 + $0x18] sm:$0xff pattern:$0x73625140] }
  0x2a   :  { %v135_v58 = vadd.f32 %v134_v50, %v133_v53  ;;  %v156_v59 = vld.sshfl [vmem:[#allocation1 + $0x20] sm:$0xff pattern:$0x73625140]  ;;  %v157_v60 = vld.sshfl [vmem:[#allocation1 + $0x28] sm:$0xff pattern:$0x73625140]  ;;  %v284_v40 = vpop.eup %283 }
  0x2b   :  { %v158_v61 = vld.sshfl [vmem:[#allocation1 + $0x30] sm:$0xff pattern:$0x73625140]  ;;  %v159_v62 = vld.sshfl [vmem:[#allocation1 + $0x38] sm:$0xff pattern:$0x73625140]  ;;  %v286_v47 = vpop.eup %285  ;;  %vm237_vm4 = vweird.f32 %v284_v40 }
  0x2c   :  { %v137_v63 = vadd.f32 %v136_v51, %v135_v58  ;;  %190 = vst [vmem:[#allocation1] ss:$4 sm:$0xff] %v276_v21  ;;  %v168_v1 = vsel %vm80_vm0, %v152_v54, 0.0  ;;  %v169_v2 = vsel %vm80_vm0, %v153_v55, 0.0  ;;  %v171_v5 = vsel %vm80_vm0, %v154_v56, 0.0 }
  0x2d   :  { %192 = vst [vmem:[#allocation1 + $0x20] ss:$4 sm:$0xff] %v277_v23  ;;  %v170_v3 = vadd.f32 %v169_v2, %v168_v1  ;;  %v173_v13 = vsel %vm80_vm0, %v155_v57, 0.0  ;;  %v175_v21 = vsel %vm80_vm0, %v156_v59, 0.0  ;;  %v177_v29 = vsel %vm80_vm0, %v157_v60, 0.0 }
  0x2e   :  { %v139_v0 = vadd.f32 %v138_v52, %v137_v63  ;;  %v179_v34 = vsel %vm80_vm0, %v158_v61, 0.0  ;;  %v181_v37 = vsel %vm80_vm0, %v159_v62, 0.0  ;;  %v233_v42 = vmul.f32 1024.0, %v284_v40  ;;  %v101_v52 = vld [vmem:[#allocation3] sm:$0x3] }
  0x2f   :  { %v172_v9 = vadd.f32 %v171_v5, %v170_v3  ;;  %v244_v49 = vmul.f32 1023.0, %v286_v47  ;;  %vm248_vm5 = vweird.f32 %v286_v47  ;;  %v187_v2 = vld [vmem:[#allocation5] sm:$0x3] }
  0x30   :  { %140 = vadd.xlane.f32.xlu0 %v139_v0  ;;  %v234_v45 = vsub.f32 1.0, %v233_v42 }
  0x31   :  { %v174_v19 = vadd.f32 %v173_v13, %v172_v9  ;;  %v245_v51 = vsub.f32 1.0, %v244_v49 }
  0x32   :  { %v235_v48 = vmul.f32 %v284_v40, %v234_v45 }
  0x33   :  { %v193_v4 = vld.sshfl [vmem:[#allocation1] sm:$0xff pattern:$0x73625140]  ;;  %v194_v6 = vld.sshfl [vmem:[#allocation1 + $0x8] sm:$0xff pattern:$0x73625140]  ;;  %v176_v27 = vadd.f32 %v175_v21, %v174_v19  ;;  %v246_v57 = vmul.f32 %v286_v47, %v245_v51 }
  0x34   :  { %v195_v7 = vld.sshfl [vmem:[#allocation1 + $0x10] sm:$0xff pattern:$0x73625140]  ;;  %v196_v8 = vld.sshfl [vmem:[#allocation1 + $0x18] sm:$0xff pattern:$0x73625140]  ;;  %v236_v50 = vadd.f32 %v284_v40, %v235_v48 }
  0x35   :  { %v209_v10 = vsel %vm80_vm0, %v193_v4, 0.0  ;;  %v210_v11 = vsel %vm80_vm0, %v194_v6, 0.0  ;;  %v212_v12 = vsel %vm80_vm0, %v195_v7, 0.0  ;;  %v197_v14 = vld.sshfl [vmem:[#allocation1 + $0x20] sm:$0xff pattern:$0x73625140]  ;;  %v178_v33 = vadd.f32 %v177_v29, %v176_v27 }
  0x36   :  { %v211_v15 = vadd.f32 %v210_v11, %v209_v10  ;;  %v214_v16 = vsel %vm80_vm0, %v196_v8, 0.0  ;;  %v198_v17 = vld.sshfl [vmem:[#allocation1 + $0x28] sm:$0xff pattern:$0x73625140]  ;;  %v216_v20 = vsel %vm80_vm0, %v197_v14, 0.0  ;;  %v238_v55 = vsel %vm237_vm4, %v284_v40, %v236_v50 }
  0x37   :  { %v199_v22 = vld.sshfl [vmem:[#allocation1 + $0x30] sm:$0xff pattern:$0x73625140]  ;;  %v218_v24 = vsel %vm80_vm0, %v198_v17, 0.0  ;;  %v180_v36 = vadd.f32 %v179_v34, %v178_v33  ;;  %v247_v59 = vadd.f32 %v286_v47, %v246_v57  ;;  %v144_v8 = vld [vmem:[#allocation4] sm:$0x3] }
  0x38   :  { %v213_v18 = vadd.f32 %v212_v12, %v211_v15  ;;  %v200_v25 = vld.sshfl [vmem:[#allocation1 + $0x38] sm:$0xff pattern:$0x73625140]  ;;  %v220_v28 = vsel %vm80_vm0, %v199_v22, 0.0 }
  0x39   :  { %v222_v31 = vsel %vm80_vm0, %v200_v25, 0.0  ;;  %v182_v38 = vadd.f32 %v181_v37, %v180_v36  ;;  %v249_v61 = vsel %vm248_vm5, %v286_v47, %v247_v59 }
  0x3a   :  { %v215_v23 = vadd.f32 %v214_v16, %v213_v18 }
  0x3c   :  { %v217_v26 = vadd.f32 %v216_v20, %v215_v23 }
  0x3e   :  { %v219_v30 = vadd.f32 %v218_v24, %v217_v26 }
  0x40   :  { %v221_v32 = vadd.f32 %v220_v28, %v219_v30 }
  0x42   :  { %v223_v35 = vadd.f32 %v222_v31, %v221_v32 }
  0x44   :  { %224 = vadd.xlane.f32.xlu1 %v223_v35 }
  0x4c   :  { %183 = vadd.xlane.f32.xlu1 %v182_v38 }
  0x98   :  { %v97_v44 = vpop.xlane.xlu0 %96 }
  0x99   :  { %v98_v46 = vadd.f32 %v97_v44, %v58_v43 }
  0x9b   :  { %100 = vst.msk [vmem:[#allocation2] sm:$0x3] %vm43_vm3, %v98_v46 }
  0xa2   :  { %v231_v56 = vld [vmem:[#allocation2] sm:$0x3] }
  0xa3   :  { %v141_v53 = vpop.xlane.xlu0 %140  ;;  %v239_v58 = vmul.f32 %v238_v55, %v231_v56 }
  0xa4   :  { %v142_v54 = vadd.f32 %v141_v53, %v101_v52 }
  0xa5   :  { %v241_v60 = vmul.f32 %v239_v58, %v231_v56 }
  0xa6   :  { %143 = vst.msk [vmem:[#allocation3] sm:$0x3] %vm43_vm3, %v142_v54 }
  0xad   :  { %v240_v62 = vld [vmem:[#allocation3] sm:$0x3] }
  0xae   :  { %v242_v63 = vsub.f32 %v240_v62, %v241_v60 }
  0xb0   :  { %v250_v0 = vmul.f32 %v249_v61, %v242_v63 }
  0xb2   :  { %v251_v1 = vmax.f32 %v250_v0, 0.0 }
  0xb4   :  { %287 = vrsqrt.f32 %v251_v1  ;;  %vm258_vm7 = vweird.f32 %v251_v1 }
  0xb7   :  { %v225_v3 = vpop.xlane.xlu1 %224 }
  0xb8   :  { %v226_v5 = vadd.f32 %v225_v3, %v187_v2 }
  0xba   :  { %v288_v4 = vpop.eup %287  ;;  %227 = vst.msk [vmem:[#allocation5] sm:$0x3] %vm43_vm3, %v226_v5 }
  0xbb   :  { %v253_v6 = vmul.f32 %v288_v4, %v251_v1  ;;  %vm259_vm6 = vweird.f32 %v288_v4 }
  0xbc   :  { %vm260_vm8 = vmor %vm258_vm7, %vm259_vm6 }
  0xbd   :  { %v254_v7 = vmul.f32 %v288_v4, %v253_v6 }
  0xbf   :  { %v184_v9 = vpop.xlane.xlu1 %183  ;;  %v255_v11 = vmul.f32 0.5, %v254_v7 }
  0xc0   :  { %v185_v10 = vadd.f32 %v184_v9, %v144_v8 }
  0xc1   :  { %v263_v12 = vld [vmem:[#allocation5] sm:$0x3]  ;;  %v256_v13 = vsub.f32 1.5, %v255_v11 }
  0xc2   :  { %186 = vst.msk [vmem:[#allocation4] sm:$0x3] %vm43_vm3, %v185_v10  ;;  %v264_v14 = vmul.f32 %v263_v12, %v239_v58 }
  0xc3   :  { %v257_v15 = vmul.f32 %v288_v4, %v256_v13 }
  0xc5   :  { %v261_v19 = vsel %vm260_vm8, %v288_v4, %v257_v15 }
  0xc9   :  { %v262_v16 = vld [vmem:[#allocation4] sm:$0x3] }
  0xca   :  { %v265_v17 = vsub.f32 %v262_v16, %v264_v14 }
  0xcc   :  { %v266_v18 = vsub.f32 0.0, %v265_v17 }
  0xce   :  { %v267_v20 = vmul.f32 %v266_v18, %v261_v19 }
  0xd0   :  { %v268_v21 = vmul.f32 %v267_v20, %v238_v55 }
  0xd2   :  { %269 = vst.msk [vmem:[%s413_s2] sm:$0x3] %vm43_vm3, %v268_v21 }
  0xd3   :  { %274 = vsyncpa [#allocation7], 1 }
  0xd4   :  { %275 = vsyncpa [#allocation9], 1 }

</bundles_post_ra>
